<compile_context>
chip_gen: v5e
topology: v5e:2x2
jax: 0.10.0
libtpu: 0.0.40
codegen_flags: <defaults>
</compile_context>

<pallas_src>
import functools

import jax
import jax.numpy as jnp
from jax import lax
from jax.experimental import pallas as pl
from jax.experimental.pallas import tpu as pltpu

BN_EPS = 1e-5
LANE = 128


def _round_up(n, m):
    return ((n + m - 1) // m) * m


def _pad_to(x, shape, value=0.0):
    pads = [(0, t - s) for s, t in zip(x.shape, shape)]
    if all(p == (0, 0) for p in pads):
        return x
    return jnp.pad(x, pads, constant_values=value)


def _vmem_capacity_bytes():
    try:
        return int(pltpu.get_tpu_info().vmem_capacity_bytes)
    except Exception:
        return 64 << 20  # conservative fallback (v7x per-core VMEM)


def _pick_layers_per_step(num_layers, hp, max_layers_per_step, wh_budget_bytes):
    """Largest divisor of num_layers whose double-buffered bf16 weight block fits the budget."""
    if hp > 256:
        cap = 1  # wide layers: one layer per step already dwarfs the ~0.35 us step overhead
    else:
        per_layer = 2 * hp * hp * 2  # double-buffered bf16 (Hp, Hp) block
        cap = max(1, min(max_layers_per_step, wh_budget_bytes // per_layer))
    for k in range(min(num_layers, cap), 0, -1):
        if num_layers % k == 0:
            return k
    return 1


def _x_decoder_kernel(z_ref, w1_ref, b1_ref, wh_ref, bh_ref, g_ref, beta_ref,
                      w2_ref, b2_ref, out_ref, h_ref):
    """Grid axis = hidden-layer block index. h_ref (bf16 VMEM scratch) carries the activation."""
    step = pl.program_id(0)
    batch = h_ref.shape[0]          # static
    inv_b = 1.0 / batch             # static python float
    k_layers = wh_ref.shape[0]      # static: hidden layers processed per grid step

    # ---- first grid step: recon_fc1 + ReLU ----
    @pl.when(step == 0)
    def _():
        a = jnp.dot(z_ref[...], w1_ref[...],
                    preferred_element_type=jnp.float32) + b1_ref[...]
        h_ref[...] = jnp.maximum(a, 0.0).astype(h_ref.dtype)

    # ---- k_layers hidden layers: Linear -> BatchNorm1d (batch stats) -> ReLU ----
    # Static unroll: k_layers is a small compile-time constant chosen by the wrapper.
    for k in range(k_layers):
        a = jnp.dot(h_ref[...], wh_ref[k],
                    preferred_element_type=jnp.float32) + bh_ref[k]
        mean = jnp.sum(a, axis=0, keepdims=True) * inv_b
        d = a - mean                                       # two-pass variance (no cancellation)
        var = jnp.sum(d * d, axis=0, keepdims=True) * inv_b
        scale = g_ref[k] * lax.rsqrt(var + BN_EPS)         # rsqrt -> EUP slot
        h_ref[...] = jnp.maximum(d * scale + beta_ref[k], 0.0).astype(h_ref.dtype)

    # ---- last grid step: recon_fc2 ----
    @pl.when(step == pl.num_programs(0) - 1)
    def _():
        out_ref[...] = jnp.dot(h_ref[...], w2_ref[...],
                               preferred_element_type=jnp.float32) + b2_ref[...]


@functools.partial(jax.jit, static_argnames=("single_buffer", "max_layers_per_step"))
def _forward(z, w1, b1, wh, bh, gamma, beta, w2, b2, *,
             single_buffer, max_layers_per_step):
    B, z_dim = z.shape
    L, H, _ = wh.shape
    F = w2.shape[1]
    assert L >= 1, "num_hidden_layers must be >= 1"  # TODO(synk): L == 0 path not implemented

    Zp = _round_up(z_dim, LANE)
    Hp = _round_up(H, LANE)
    Fp = _round_up(F, LANE)

    # Lane-pad every feature dim to a multiple of 128.  Padding invariants: everything pads
    # with 0.0 except gamma (pads with 1.0) -> padded hidden lanes stay exactly 0 throughout.
    z_p = _pad_to(z.astype(jnp.bfloat16), (B, Zp))
    w1_p = _pad_to(w1.astype(jnp.bfloat16), (Zp, Hp))
    b1_p = _pad_to(b1.reshape(1, H), (1, Hp))
    wh_p = _pad_to(wh.astype(jnp.bfloat16), (L, Hp, Hp))
    bh_p = _pad_to(bh.reshape(L, 1, H), (L, 1, Hp))
    g_p = _pad_to(gamma.reshape(L, 1, H), (L, 1, Hp), value=1.0)
    beta_p = _pad_to(beta.reshape(L, 1, H), (L, 1, Hp))
    w2_p = _pad_to(w2.astype(jnp.bfloat16), (Hp, Fp))
    b2_p = _pad_to(b2.reshape(1, F), (1, Fp))

    vmem_cap = (_vmem_capacity_bytes() * 3) // 4          # ~96 MiB v5e/v6e, ~48 MiB v7x
    K = _pick_layers_per_step(L, Hp, max_layers_per_step, wh_budget_bytes=vmem_cap // 8)
    n_steps = L // K

    # VMEM budget from actual padded block sizes x buffer counts (+ headroom), capped per gen.
    const_bufs = 1 if single_buffer else 2
    need = (const_bufs * (B * Zp * 2 + Zp * Hp * 2 + Hp * 4 + Hp * Fp * 2 + Fp * 4)  # z,w1,b1,w2,b2
            + 2 * (K * Hp * Hp * 2 + 3 * K * Hp * 4)      # wh / bh / gamma / beta (double-buffered)
            + 2 * (B * Fp * 4)                            # output block
            + B * Hp * 2)                                 # carried h scratch (bf16)
    vmem_limit = int(min(vmem_cap, max(need + need // 2 + (2 << 20), 32 << 20)))

    flops = 2 * B * (Zp * Hp + L * Hp * Hp + Hp * Fp)
    bytes_accessed = (2 * (z_p.size + w1_p.size + wh_p.size + w2_p.size)            # bf16
                      + 4 * (b1_p.size + bh_p.size + g_p.size + beta_p.size
                             + b2_p.size + B * Fp))                                  # f32
    cost = pl.CostEstimate(flops=flops, transcendentals=L * Hp,
                           bytes_accessed=bytes_accessed)

    def _const_spec(shape):
        # Constant-index blocks don't need double buffering (fetched once, never re-indexed).
        if single_buffer:
            return pl.BlockSpec(shape, lambda s: (0,) * len(shape),
                                pipeline_mode=pl.Buffered(1))
        return pl.BlockSpec(shape, lambda s: (0,) * len(shape))

    grid_spec = pltpu.PrefetchScalarGridSpec(
        num_scalar_prefetch=0,
        grid=(n_steps,),                                     # stream K hidden layers per step
        in_specs=[
            _const_spec((B, Zp)),                            # z      (resident, bf16)
            _const_spec((Zp, Hp)),                           # w1     (resident, bf16)
            _const_spec((1, Hp)),                            # b1
            pl.BlockSpec((K, Hp, Hp), lambda s: (s, 0, 0)),  # wh[s*K:(s+1)*K]  (pipelined)
            pl.BlockSpec((K, 1, Hp), lambda s: (s, 0, 0)),   # bh
            pl.BlockSpec((K, 1, Hp), lambda s: (s, 0, 0)),   # gamma
            pl.BlockSpec((K, 1, Hp), lambda s: (s, 0, 0)),   # beta
            _const_spec((Hp, Fp)),                           # w2     (resident, bf16)
            _const_spec((1, Fp)),                            # b2
        ],
        out_specs=pl.BlockSpec((B, Fp), lambda s: (0, 0)),   # written on the last step only
        scratch_shapes=[pltpu.VMEM((B, Hp), jnp.bfloat16)],  # carried activation h (bf16)
    )

    out_p = pl.pallas_call(
        _x_decoder_kernel,
        out_shape=jax.ShapeDtypeStruct((B, Fp), jnp.float32),
        grid_spec=grid_spec,
        compiler_params=pltpu.CompilerParams(
            dimension_semantics=("arbitrary",),              # layer axis carries h
            vmem_limit_bytes=vmem_limit,
        ),
        cost_estimate=cost,
    )(z_p, w1_p, b1_p, wh_p, bh_p, g_p, beta_p, w2_p, b2_p)

    return out_p[:, :F]


def x_decoder_forward(z, w1, b1, wh, bh, gamma, beta, w2, b2, *, max_layers_per_step=8):
    """z:[B,z_dim]  w1:[z_dim,H]  b1:[H]  wh:[L,H,H]  bh/gamma/beta:[L,H]  w2:[H,F]  b2:[F]."""
    try:
        return _forward(z, w1, b1, wh, bh, gamma, beta, w2, b2,
                        single_buffer=True, max_layers_per_step=max_layers_per_step)
    except Exception:
        # Older Pallas versions may reject pipeline_mode=pl.Buffered(1) on top-level
        # BlockSpecs; fall back to default double-buffering of the constant-index blocks.
        return _forward(z, w1, b1, wh, bh, gamma, beta, w2, b2,
                        single_buffer=False, max_layers_per_step=max_layers_per_step)


# ---------------- pure-JAX references ----------------

def _reference_forward_bf16(z, w1, b1, wh, bh, gamma, beta, w2, b2):
    """Mirrors the kernel math (bf16 MXU operands, f32 accumulate, two-pass batch-stat BN)."""
    def mm(x, w):
        return jnp.dot(x.astype(jnp.bfloat16), w.astype(jnp.bfloat16),
                       preferred_element_type=jnp.float32)
    B = z.shape[0]
    inv_b = 1.0 / B
    h = jnp.maximum(mm(z, w1) + b1, 0.0)
    for l in range(wh.shape[0]):
        a = mm(h, wh[l]) + bh[l]
        mean = jnp.sum(a, axis=0, keepdims=True) * inv_b
        d = a - mean
        var = jnp.sum(d * d, axis=0, keepdims=True) * inv_b
        scale = gamma[l] * lax.rsqrt(var + BN_EPS)
        h = jnp.maximum(d * scale + beta[l], 0.0)
    return mm(h, w2) + b2


def _reference_forward_f32(z, w1, b1, wh, bh, gamma, beta, w2, b2):
    """PyTorch-style f32 reference (train-mode BN, biased variance)."""
    h = jnp.maximum(z @ w1 + b1, 0.0)
    for l in range(wh.shape[0]):
        a = h @ wh[l] + bh[l]
        mean = jnp.mean(a, axis=0, keepdims=True)
        var = jnp.mean((a - mean) ** 2, axis=0, keepdims=True)
        a = (a - mean) / jnp.sqrt(var + BN_EPS) * gamma[l] + beta[l]
        h = jnp.maximum(a, 0.0)
    return h @ w2 + b2


if __name__ == "__main__":
    # Small shapes consistent with the module (scaled up slightly); 4 hidden layers with
    # max_layers_per_step=2 exercise both the per-step unroll and the cross-step carry.
    batch = 8
    z_dim = 4
    hidden_size = 32
    feature_dim = 8
    num_hidden_layers = 4

    key = jax.random.PRNGKey(0)
    ks = jax.random.split(key, 8)

    # Deterministic synthetic parameters (weights stored [in, out]; biases 1-D).
    w1 = jax.random.normal(ks[0], (z_dim, hidden_size), jnp.float32) * 0.2
    b1 = jax.random.normal(ks[1], (hidden_size,), jnp.float32) * 0.1
    wh = jax.random.normal(ks[2], (num_hidden_layers, hidden_size, hidden_size), jnp.float32) * 0.2
    bh = jax.random.normal(ks[3], (num_hidden_layers, hidden_size), jnp.float32) * 0.1
    gamma = jnp.ones((num_hidden_layers, hidden_size), jnp.float32)   # BN weight init (PyTorch default)
    beta = jnp.zeros((num_hidden_layers, hidden_size), jnp.float32)   # BN bias init
    w2 = jax.random.normal(ks[4], (hidden_size, feature_dim), jnp.float32) * 0.2
    b2 = jax.random.normal(ks[5], (feature_dim,), jnp.float32) * 0.1
    z = jax.random.normal(ks[6], (batch, z_dim), jnp.float32)

    out = jax.block_until_ready(
        x_decoder_forward(z, w1, b1, wh, bh, gamma, beta, w2, b2, max_layers_per_step=2))

    ref_bf16 = _reference_forward_bf16(z, w1, b1, wh, bh, gamma, beta, w2, b2)
    ref_f32 = _reference_forward_f32(z, w1, b1, wh, bh, gamma, beta, w2, b2)

    assert out.shape == (batch, feature_dim)
    # Tight check vs the bf16-matched reference (validates the kernel math).
    assert jnp.allclose(out, ref_bf16, atol=2e-3, rtol=2e-3), "mismatch vs bf16-matched reference"
    # Loose sanity check vs the full-f32 PyTorch-style forward (bf16 MXU rounding only).
    assert jnp.allclose(out, ref_f32, atol=1e-1, rtol=1e-1), "mismatch vs f32 reference"

    print("KERNEL_OK")
</pallas_src>

<mosaic_0001>
module attributes {stable_mosaic.version = 11 : i64} {
  func.func @_x_decoder_kernel(%arg0: i32, %arg1: memref<8x128xbf16, #tpu.memory_space<vmem>>, %arg2: memref<128x128xbf16, #tpu.memory_space<vmem>>, %arg3: memref<1x128xf32, #tpu.memory_space<vmem>>, %arg4: memref<2x128x128xbf16, #tpu.memory_space<vmem>>, %arg5: memref<2x1x128xf32, #tpu.memory_space<vmem>>, %arg6: memref<2x1x128xf32, #tpu.memory_space<vmem>>, %arg7: memref<2x1x128xf32, #tpu.memory_space<vmem>>, %arg8: memref<128x128xbf16, #tpu.memory_space<vmem>>, %arg9: memref<1x128xf32, #tpu.memory_space<vmem>>, %arg10: memref<8x128xf32, #tpu.memory_space<vmem>>, %arg11: memref<8x128xbf16, #tpu.memory_space<vmem>>) attributes {dimension_semantics = [#tpu.dimension_semantics<arbitrary>], iteration_bounds = array<i64: 2>, scalar_prefetch = 0 : i64, scratch_operands = 1 : i64, tpu.core_type = #tpu.core_type<tc>, window_params = [{pipeline_mode = #tpu.pipeline_mode<synchronous>, transform_indices = @transform_0, window_bounds = array<i64: 8, 128>}, {pipeline_mode = #tpu.pipeline_mode<synchronous>, transform_indices = @transform_1, window_bounds = array<i64: 128, 128>}, {pipeline_mode = #tpu.pipeline_mode<synchronous>, transform_indices = @transform_2, window_bounds = array<i64: 1, 128>}, {transform_indices = @transform_3, window_bounds = array<i64: 2, 128, 128>}, {transform_indices = @transform_4, window_bounds = array<i64: 2, 1, 128>}, {transform_indices = @transform_5, window_bounds = array<i64: 2, 1, 128>}, {transform_indices = @transform_6, window_bounds = array<i64: 2, 1, 128>}, {pipeline_mode = #tpu.pipeline_mode<synchronous>, transform_indices = @transform_7, window_bounds = array<i64: 128, 128>}, {pipeline_mode = #tpu.pipeline_mode<synchronous>, transform_indices = @transform_8, window_bounds = array<i64: 1, 128>}, {pipeline_mode = #tpu.pipeline_mode<synchronous>, transform_indices = @transform_9, window_bounds = array<i64: 8, 128>}]} {
    %c0_i32 = arith.constant 0 : i32
    %0 = arith.cmpi eq, %arg0, %c0_i32 : i32
    %1 = arith.extui %0 : i1 to i32
    %c0_i32_0 = arith.constant 0 : i32
    %2 = arith.cmpi ne, %1, %c0_i32_0 : i32
    scf.if %2 {
      %c0_45 = arith.constant 0 : index
      %c0_46 = arith.constant 0 : index
      %76 = vector.load %arg1[%c0_45, %c0_46] : memref<8x128xbf16, #tpu.memory_space<vmem>>, vector<8x128xbf16>
      %c0_47 = arith.constant 0 : index
      %c0_48 = arith.constant 0 : index
      %77 = vector.load %arg2[%c0_47, %c0_48] : memref<128x128xbf16, #tpu.memory_space<vmem>>, vector<128x128xbf16>
      %cst_49 = arith.constant dense<0.000000e+00> : vector<8x128xf32>
      %78 = tpu.matmul %76, %77, %cst_49 {dimension_numbers = #tpu.dot_dimension_numbers<[1], [0], [0], [1], [0, 0, 1, 1], [], []>} : vector<8x128xbf16>, vector<128x128xbf16>, vector<8x128xf32> -> vector<8x128xf32>
      %c0_50 = arith.constant 0 : index
      %c0_51 = arith.constant 0 : index
      %79 = vector.load %arg3[%c0_50, %c0_51] : memref<1x128xf32, #tpu.memory_space<vmem>>, vector<1x128xf32>
      %80 = vector.broadcast %79 : vector<1x128xf32> to vector<8x128xf32>
      %81 = arith.addf %78, %80 : vector<8x128xf32>
      %cst_52 = arith.constant 0.000000e+00 : f32
      %82 = vector.broadcast %cst_52 : f32 to vector<8x128xf32>
      %83 = arith.maximumf %81, %82 : vector<8x128xf32>
      %84 = arith.truncf %83 : vector<8x128xf32> to vector<8x128xbf16>
      %c0_53 = arith.constant 0 : index
      %c0_54 = arith.constant 0 : index
      %85 = vector.load %arg11[%c0_53, %c0_54] : memref<8x128xbf16, #tpu.memory_space<vmem>>, vector<8x128xbf16>
      tpu.vector_store %arg11[%c0_53, %c0_54], %84 {strides = array<i32>} : memref<8x128xbf16, #tpu.memory_space<vmem>>, vector<8x128xbf16>,
    } else {
    }
    %c0 = arith.constant 0 : index
    %c0_1 = arith.constant 0 : index
    %3 = vector.load %arg11[%c0, %c0_1] : memref<8x128xbf16, #tpu.memory_space<vmem>>, vector<8x128xbf16>
    %c0_2 = arith.constant 0 : index
    %c0_3 = arith.constant 0 : index
    %c0_4 = arith.constant 0 : index
    %4 = vector.load %arg4[%c0_2, %c0_3, %c0_4] : memref<2x128x128xbf16, #tpu.memory_space<vmem>>, vector<1x128x128xbf16>
    %5 = vector.shape_cast %4 : vector<1x128x128xbf16> to vector<128x128xbf16>
    %cst = arith.constant dense<0.000000e+00> : vector<8x128xf32>
    %6 = tpu.matmul %3, %5, %cst {dimension_numbers = #tpu.dot_dimension_numbers<[1], [0], [0], [1], [0, 0, 1, 1], [], []>} : vector<8x128xbf16>, vector<128x128xbf16>, vector<8x128xf32> -> vector<8x128xf32>
    %c0_5 = arith.constant 0 : index
    %c0_6 = arith.constant 0 : index
    %c0_7 = arith.constant 0 : index
    %7 = vector.load %arg5[%c0_5, %c0_6, %c0_7] : memref<2x1x128xf32, #tpu.memory_space<vmem>>, vector<1x1x128xf32>
    %8 = vector.shape_cast %7 : vector<1x1x128xf32> to vector<1x128xf32>
    %9 = vector.broadcast %8 : vector<1x128xf32> to vector<8x128xf32>
    %10 = arith.addf %6, %9 : vector<8x128xf32>
    %cst_8 = arith.constant dense<0.000000e+00> : vector<128xf32>
    %11 = vector.multi_reduction <add>, %10, %cst_8 [0] : vector<8x128xf32> to vector<128xf32>
    %12 = vector.shape_cast %11 : vector<128xf32> to vector<1x128xf32>
    %cst_9 = arith.constant 1.250000e-01 : f32
    %13 = vector.broadcast %cst_9 : f32 to vector<1x128xf32>
    %14 = arith.mulf %12, %13 : vector<1x128xf32>
    %15 = vector.broadcast %14 : vector<1x128xf32> to vector<8x128xf32>
    %16 = arith.subf %10, %15 : vector<8x128xf32>
    %17 = arith.mulf %16, %16 : vector<8x128xf32>
    %cst_10 = arith.constant dense<0.000000e+00> : vector<128xf32>
    %18 = vector.multi_reduction <add>, %17, %cst_10 [0] : vector<8x128xf32> to vector<128xf32>
    %19 = vector.shape_cast %18 : vector<128xf32> to vector<1x128xf32>
    %cst_11 = arith.constant 1.250000e-01 : f32
    %20 = vector.broadcast %cst_11 : f32 to vector<1x128xf32>
    %21 = arith.mulf %19, %20 : vector<1x128xf32>
    %c0_12 = arith.constant 0 : index
    %c0_13 = arith.constant 0 : index
    %c0_14 = arith.constant 0 : index
    %22 = vector.load %arg6[%c0_12, %c0_13, %c0_14] : memref<2x1x128xf32, #tpu.memory_space<vmem>>, vector<1x1x128xf32>
    %23 = vector.shape_cast %22 : vector<1x1x128xf32> to vector<1x128xf32>
    %cst_15 = arith.constant 9.99999974E-6 : f32
    %24 = vector.broadcast %cst_15 : f32 to vector<1x128xf32>
    %25 = arith.addf %21, %24 : vector<1x128xf32>
    %26 = math.rsqrt %25 : vector<1x128xf32>
    %27 = arith.mulf %23, %26 : vector<1x128xf32>
    %28 = vector.broadcast %27 : vector<1x128xf32> to vector<8x128xf32>
    %29 = arith.mulf %16, %28 : vector<8x128xf32>
    %c0_16 = arith.constant 0 : index
    %c0_17 = arith.constant 0 : index
    %c0_18 = arith.constant 0 : index
    %30 = vector.load %arg7[%c0_16, %c0_17, %c0_18] : memref<2x1x128xf32, #tpu.memory_space<vmem>>, vector<1x1x128xf32>
    %31 = vector.shape_cast %30 : vector<1x1x128xf32> to vector<1x128xf32>
    %32 = vector.broadcast %31 : vector<1x128xf32> to vector<8x128xf32>
    %33 = arith.addf %29, %32 : vector<8x128xf32>
    %cst_19 = arith.constant 0.000000e+00 : f32
    %34 = vector.broadcast %cst_19 : f32 to vector<8x128xf32>
    %35 = arith.maximumf %33, %34 : vector<8x128xf32>
    %36 = arith.truncf %35 : vector<8x128xf32> to vector<8x128xbf16>
    %c0_20 = arith.constant 0 : index
    %c0_21 = arith.constant 0 : index
    %37 = vector.load %arg11[%c0_20, %c0_21] : memref<8x128xbf16, #tpu.memory_space<vmem>>, vector<8x128xbf16>
    tpu.vector_store %arg11[%c0_20, %c0_21], %36 {strides = array<i32>} : memref<8x128xbf16, #tpu.memory_space<vmem>>, vector<8x128xbf16>,
    %c0_22 = arith.constant 0 : index
    %c0_23 = arith.constant 0 : index
    %38 = vector.load %arg11[%c0_22, %c0_23] : memref<8x128xbf16, #tpu.memory_space<vmem>>, vector<8x128xbf16>
    %c1 = arith.constant 1 : index
    %c0_24 = arith.constant 0 : index
    %c0_25 = arith.constant 0 : index
    %39 = vector.load %arg4[%c1, %c0_24, %c0_25] : memref<2x128x128xbf16, #tpu.memory_space<vmem>>, vector<1x128x128xbf16>
    %40 = vector.shape_cast %39 : vector<1x128x128xbf16> to vector<128x128xbf16>
    %cst_26 = arith.constant dense<0.000000e+00> : vector<8x128xf32>
    %41 = tpu.matmul %38, %40, %cst_26 {dimension_numbers = #tpu.dot_dimension_numbers<[1], [0], [0], [1], [0, 0, 1, 1], [], []>} : vector<8x128xbf16>, vector<128x128xbf16>, vector<8x128xf32> -> vector<8x128xf32>
    %c1_27 = arith.constant 1 : index
    %c0_28 = arith.constant 0 : index
    %c0_29 = arith.constant 0 : index
    %42 = vector.load %arg5[%c1_27, %c0_28, %c0_29] : memref<2x1x128xf32, #tpu.memory_space<vmem>>, vector<1x1x128xf32>
    %43 = vector.shape_cast %42 : vector<1x1x128xf32> to vector<1x128xf32>
    %44 = vector.broadcast %43 : vector<1x128xf32> to vector<8x128xf32>
    %45 = arith.addf %41, %44 : vector<8x128xf32>
    %cst_30 = arith.constant dense<0.000000e+00> : vector<128xf32>
    %46 = vector.multi_reduction <add>, %45, %cst_30 [0] : vector<8x128xf32> to vector<128xf32>
    %47 = vector.shape_cast %46 : vector<128xf32> to vector<1x128xf32>
    %cst_31 = arith.constant 1.250000e-01 : f32
    %48 = vector.broadcast %cst_31 : f32 to vector<1x128xf32>
    %49 = arith.mulf %47, %48 : vector<1x128xf32>
    %50 = vector.broadcast %49 : vector<1x128xf32> to vector<8x128xf32>
    %51 = arith.subf %45, %50 : vector<8x128xf32>
    %52 = arith.mulf %51, %51 : vector<8x128xf32>
    %cst_32 = arith.constant dense<0.000000e+00> : vector<128xf32>
    %53 = vector.multi_reduction <add>, %52, %cst_32 [0] : vector<8x128xf32> to vector<128xf32>
    %54 = vector.shape_cast %53 : vector<128xf32> to vector<1x128xf32>
    %cst_33 = arith.constant 1.250000e-01 : f32
    %55 = vector.broadcast %cst_33 : f32 to vector<1x128xf32>
    %56 = arith.mulf %54, %55 : vector<1x128xf32>
    %c1_34 = arith.constant 1 : index
    %c0_35 = arith.constant 0 : index
    %c0_36 = arith.constant 0 : index
    %57 = vector.load %arg6[%c1_34, %c0_35, %c0_36] : memref<2x1x128xf32, #tpu.memory_space<vmem>>, vector<1x1x128xf32>
    %58 = vector.shape_cast %57 : vector<1x1x128xf32> to vector<1x128xf32>
    %cst_37 = arith.constant 9.99999974E-6 : f32
    %59 = vector.broadcast %cst_37 : f32 to vector<1x128xf32>
    %60 = arith.addf %56, %59 : vector<1x128xf32>
    %61 = math.rsqrt %60 : vector<1x128xf32>
    %62 = arith.mulf %58, %61 : vector<1x128xf32>
    %63 = vector.broadcast %62 : vector<1x128xf32> to vector<8x128xf32>
    %64 = arith.mulf %51, %63 : vector<8x128xf32>
    %c1_38 = arith.constant 1 : index
    %c0_39 = arith.constant 0 : index
    %c0_40 = arith.constant 0 : index
    %65 = vector.load %arg7[%c1_38, %c0_39, %c0_40] : memref<2x1x128xf32, #tpu.memory_space<vmem>>, vector<1x1x128xf32>
    %66 = vector.shape_cast %65 : vector<1x1x128xf32> to vector<1x128xf32>
    %67 = vector.broadcast %66 : vector<1x128xf32> to vector<8x128xf32>
    %68 = arith.addf %64, %67 : vector<8x128xf32>
    %cst_41 = arith.constant 0.000000e+00 : f32
    %69 = vector.broadcast %cst_41 : f32 to vector<8x128xf32>
    %70 = arith.maximumf %68, %69 : vector<8x128xf32>
    %71 = arith.truncf %70 : vector<8x128xf32> to vector<8x128xbf16>
    %c0_42 = arith.constant 0 : index
    %c0_43 = arith.constant 0 : index
    %72 = vector.load %arg11[%c0_42, %c0_43] : memref<8x128xbf16, #tpu.memory_space<vmem>>, vector<8x128xbf16>
    tpu.vector_store %arg11[%c0_42, %c0_43], %71 {strides = array<i32>} : memref<8x128xbf16, #tpu.memory_space<vmem>>, vector<8x128xbf16>,
    %c1_i32 = arith.constant 1 : i32
    %73 = arith.cmpi eq, %arg0, %c1_i32 : i32
    %74 = arith.extui %73 : i1 to i32
    %c0_i32_44 = arith.constant 0 : i32
    %75 = arith.cmpi ne, %74, %c0_i32_44 : i32
    scf.if %75 {
      %c0_45 = arith.constant 0 : index
      %c0_46 = arith.constant 0 : index
      %76 = vector.load %arg11[%c0_45, %c0_46] : memref<8x128xbf16, #tpu.memory_space<vmem>>, vector<8x128xbf16>
      %c0_47 = arith.constant 0 : index
      %c0_48 = arith.constant 0 : index
      %77 = vector.load %arg8[%c0_47, %c0_48] : memref<128x128xbf16, #tpu.memory_space<vmem>>, vector<128x128xbf16>
      %cst_49 = arith.constant dense<0.000000e+00> : vector<8x128xf32>
      %78 = tpu.matmul %76, %77, %cst_49 {dimension_numbers = #tpu.dot_dimension_numbers<[1], [0], [0], [1], [0, 0, 1, 1], [], []>} : vector<8x128xbf16>, vector<128x128xbf16>, vector<8x128xf32> -> vector<8x128xf32>
      %c0_50 = arith.constant 0 : index
      %c0_51 = arith.constant 0 : index
      %79 = vector.load %arg9[%c0_50, %c0_51] : memref<1x128xf32, #tpu.memory_space<vmem>>, vector<1x128xf32>
      %80 = vector.broadcast %79 : vector<1x128xf32> to vector<8x128xf32>
      %81 = arith.addf %78, %80 : vector<8x128xf32>
      %c0_52 = arith.constant 0 : index
      %c0_53 = arith.constant 0 : index
      %82 = vector.load %arg10[%c0_52, %c0_53] : memref<8x128xf32, #tpu.memory_space<vmem>>, vector<8x128xf32>
      tpu.vector_store %arg10[%c0_52, %c0_53], %81 {strides = array<i32>} : memref<8x128xf32, #tpu.memory_space<vmem>>, vector<8x128xf32>,
    } else {
    }
    return
  }
  func.func @transform_0(%arg0: i32) -> (i32, i32) {
    %c0_i32 = arith.constant 0 : i32
    %c0_i32_0 = arith.constant 0 : i32
    %c0_i32_1 = arith.constant 0 : i32
    return %c0_i32, %c0_i32_0 : i32, i32
  }
  func.func @transform_1(%arg0: i32) -> (i32, i32) {
    %c0_i32 = arith.constant 0 : i32
    %c0_i32_0 = arith.constant 0 : i32
    %c0_i32_1 = arith.constant 0 : i32
    return %c0_i32, %c0_i32_0 : i32, i32
  }
  func.func @transform_2(%arg0: i32) -> (i32, i32) {
    %c0_i32 = arith.constant 0 : i32
    %c0_i32_0 = arith.constant 0 : i32
    %c0_i32_1 = arith.constant 0 : i32
    return %c0_i32, %c0_i32_0 : i32, i32
  }
  func.func @transform_3(%arg0: i32) -> (i32, i32, i32) {
    %c0_i32 = arith.constant 0 : i32
    %c0_i32_0 = arith.constant 0 : i32
    %c0_i32_1 = arith.constant 0 : i32
    return %arg0, %c0_i32, %c0_i32_0 : i32, i32, i32
  }
  func.func @transform_4(%arg0: i32) -> (i32, i32, i32) {
    %c0_i32 = arith.constant 0 : i32
    %c0_i32_0 = arith.constant 0 : i32
    %c0_i32_1 = arith.constant 0 : i32
    return %arg0, %c0_i32, %c0_i32_0 : i32, i32, i32
  }
  func.func @transform_5(%arg0: i32) -> (i32, i32, i32) {
    %c0_i32 = arith.constant 0 : i32
    %c0_i32_0 = arith.constant 0 : i32
    %c0_i32_1 = arith.constant 0 : i32
    return %arg0, %c0_i32, %c0_i32_0 : i32, i32, i32
  }
  func.func @transform_6(%arg0: i32) -> (i32, i32, i32) {
    %c0_i32 = arith.constant 0 : i32
    %c0_i32_0 = arith.constant 0 : i32
    %c0_i32_1 = arith.constant 0 : i32
    return %arg0, %c0_i32, %c0_i32_0 : i32, i32, i32
  }
  func.func @transform_7(%arg0: i32) -> (i32, i32) {
    %c0_i32 = arith.constant 0 : i32
    %c0_i32_0 = arith.constant 0 : i32
    %c0_i32_1 = arith.constant 0 : i32
    return %c0_i32, %c0_i32_0 : i32, i32
  }
  func.func @transform_8(%arg0: i32) -> (i32, i32) {
    %c0_i32 = arith.constant 0 : i32
    %c0_i32_0 = arith.constant 0 : i32
    %c0_i32_1 = arith.constant 0 : i32
    return %c0_i32, %c0_i32_0 : i32, i32
  }
  func.func @transform_9(%arg0: i32) -> (i32, i32) {
    %c0_i32 = arith.constant 0 : i32
    %c0_i32_0 = arith.constant 0 : i32
    %c0_i32_1 = arith.constant 0 : i32
    return %c0_i32, %c0_i32_0 : i32, i32
  }
}

module attributes {stable_mosaic.version = 11 : i64} {
  func.func @_x_decoder_kernel(%arg0: i32, %arg1: memref<8x128xbf16, #tpu.memory_space<vmem>>, %arg2: memref<128x128xbf16, #tpu.memory_space<vmem>>, %arg3: memref<1x128xf32, #tpu.memory_space<vmem>>, %arg4: memref<2x128x128xbf16, #tpu.memory_space<vmem>>, %arg5: memref<2x1x128xf32, #tpu.memory_space<vmem>>, %arg6: memref<2x1x128xf32, #tpu.memory_space<vmem>>, %arg7: memref<2x1x128xf32, #tpu.memory_space<vmem>>, %arg8: memref<128x128xbf16, #tpu.memory_space<vmem>>, %arg9: memref<1x128xf32, #tpu.memory_space<vmem>>, %arg10: memref<8x128xf32, #tpu.memory_space<vmem>>, %arg11: memref<8x128xbf16, #tpu.memory_space<vmem>>) attributes {dimension_semantics = [#tpu.dimension_semantics<arbitrary>], iteration_bounds = array<i64: 2>, scalar_prefetch = 0 : i64, scratch_operands = 1 : i64, tpu.core_type = #tpu.core_type<tc>, window_params = [{pipeline_mode = #tpu.pipeline_mode<synchronous>, transform_indices = @transform_0, window_bounds = array<i64: 8, 128>}, {pipeline_mode = #tpu.pipeline_mode<synchronous>, transform_indices = @transform_1, window_bounds = array<i64: 128, 128>}, {pipeline_mode = #tpu.pipeline_mode<synchronous>, transform_indices = @transform_2, window_bounds = array<i64: 1, 128>}, {transform_indices = @transform_3, window_bounds = array<i64: 2, 128, 128>}, {transform_indices = @transform_4, window_bounds = array<i64: 2, 1, 128>}, {transform_indices = @transform_5, window_bounds = array<i64: 2, 1, 128>}, {transform_indices = @transform_6, window_bounds = array<i64: 2, 1, 128>}, {pipeline_mode = #tpu.pipeline_mode<synchronous>, transform_indices = @transform_7, window_bounds = array<i64: 128, 128>}, {pipeline_mode = #tpu.pipeline_mode<synchronous>, transform_indices = @transform_8, window_bounds = array<i64: 1, 128>}, {pipeline_mode = #tpu.pipeline_mode<synchronous>, transform_indices = @transform_9, window_bounds = array<i64: 8, 128>}]} {
    %c0_i32 = arith.constant 0 : i32
    %0 = arith.cmpi eq, %arg0, %c0_i32 : i32
    %1 = arith.extui %0 : i1 to i32
    %c0_i32_0 = arith.constant 0 : i32
    %2 = arith.cmpi ne, %1, %c0_i32_0 : i32
    scf.if %2 {
      %c0_45 = arith.constant 0 : index
      %c0_46 = arith.constant 0 : index
      %76 = vector.load %arg1[%c0_45, %c0_46] : memref<8x128xbf16, #tpu.memory_space<vmem>>, vector<8x128xbf16>
      %c0_47 = arith.constant 0 : index
      %c0_48 = arith.constant 0 : index
      %77 = vector.load %arg2[%c0_47, %c0_48] : memref<128x128xbf16, #tpu.memory_space<vmem>>, vector<128x128xbf16>
      %cst_49 = arith.constant dense<0.000000e+00> : vector<8x128xf32>
      %78 = tpu.matmul %76, %77, %cst_49 {dimension_numbers = #tpu.dot_dimension_numbers<[1], [0], [0], [1], [0, 0, 1, 1], [], []>} : vector<8x128xbf16>, vector<128x128xbf16>, vector<8x128xf32> -> vector<8x128xf32>
      %c0_50 = arith.constant 0 : index
      %c0_51 = arith.constant 0 : index
      %79 = vector.load %arg3[%c0_50, %c0_51] : memref<1x128xf32, #tpu.memory_space<vmem>>, vector<1x128xf32>
      %80 = vector.broadcast %79 : vector<1x128xf32> to vector<8x128xf32>
      %81 = arith.addf %78, %80 : vector<8x128xf32>
      %cst_52 = arith.constant 0.000000e+00 : f32
      %82 = vector.broadcast %cst_52 : f32 to vector<8x128xf32>
      %83 = arith.maximumf %81, %82 : vector<8x128xf32>
      %84 = arith.truncf %83 : vector<8x128xf32> to vector<8x128xbf16>
      %c0_53 = arith.constant 0 : index
      %c0_54 = arith.constant 0 : index
      %85 = vector.load %arg11[%c0_53, %c0_54] : memref<8x128xbf16, #tpu.memory_space<vmem>>, vector<8x128xbf16>
      tpu.vector_store %arg11[%c0_53, %c0_54], %84 {strides = array<i32>} : memref<8x128xbf16, #tpu.memory_space<vmem>>, vector<8x128xbf16>,
    } else {
    }
    %c0 = arith.constant 0 : index
    %c0_1 = arith.constant 0 : index
    %3 = vector.load %arg11[%c0, %c0_1] : memref<8x128xbf16, #tpu.memory_space<vmem>>, vector<8x128xbf16>
    %c0_2 = arith.constant 0 : index
    %c0_3 = arith.constant 0 : index
    %c0_4 = arith.constant 0 : index
    %4 = vector.load %arg4[%c0_2, %c0_3, %c0_4] : memref<2x128x128xbf16, #tpu.memory_space<vmem>>, vector<1x128x128xbf16>
    %5 = vector.shape_cast %4 : vector<1x128x128xbf16> to vector<128x128xbf16>
    %cst = arith.constant dense<0.000000e+00> : vector<8x128xf32>
    %6 = tpu.matmul %3, %5, %cst {dimension_numbers = #tpu.dot_dimension_numbers<[1], [0], [0], [1], [0, 0, 1, 1], [], []>} : vector<8x128xbf16>, vector<128x128xbf16>, vector<8x128xf32> -> vector<8x128xf32>
    %c0_5 = arith.constant 0 : index
    %c0_6 = arith.constant 0 : index
    %c0_7 = arith.constant 0 : index
    %7 = vector.load %arg5[%c0_5, %c0_6, %c0_7] : memref<2x1x128xf32, #tpu.memory_space<vmem>>, vector<1x1x128xf32>
    %8 = vector.shape_cast %7 : vector<1x1x128xf32> to vector<1x128xf32>
    %9 = vector.broadcast %8 : vector<1x128xf32> to vector<8x128xf32>
    %10 = arith.addf %6, %9 : vector<8x128xf32>
    %cst_8 = arith.constant dense<0.000000e+00> : vector<128xf32>
    %11 = vector.multi_reduction <add>, %10, %cst_8 [0] : vector<8x128xf32> to vector<128xf32>
    %12 = vector.shape_cast %11 : vector<128xf32> to vector<1x128xf32>
    %cst_9 = arith.constant 1.250000e-01 : f32
    %13 = vector.broadcast %cst_9 : f32 to vector<1x128xf32>
    %14 = arith.mulf %12, %13 : vector<1x128xf32>
    %15 = vector.broadcast %14 : vector<1x128xf32> to vector<8x128xf32>
    %16 = arith.subf %10, %15 : vector<8x128xf32>
    %17 = arith.mulf %16, %16 : vector<8x128xf32>
    %cst_10 = arith.constant dense<0.000000e+00> : vector<128xf32>
    %18 = vector.multi_reduction <add>, %17, %cst_10 [0] : vector<8x128xf32> to vector<128xf32>
    %19 = vector.shape_cast %18 : vector<128xf32> to vector<1x128xf32>
    %cst_11 = arith.constant 1.250000e-01 : f32
    %20 = vector.broadcast %cst_11 : f32 to vector<1x128xf32>
    %21 = arith.mulf %19, %20 : vector<1x128xf32>
    %c0_12 = arith.constant 0 : index
    %c0_13 = arith.constant 0 : index
    %c0_14 = arith.constant 0 : index
    %22 = vector.load %arg6[%c0_12, %c0_13, %c0_14] : memref<2x1x128xf32, #tpu.memory_space<vmem>>, vector<1x1x128xf32>
    %23 = vector.shape_cast %22 : vector<1x1x128xf32> to vector<1x128xf32>
    %cst_15 = arith.constant 9.99999974E-6 : f32
    %24 = vector.broadcast %cst_15 : f32 to vector<1x128xf32>
    %25 = arith.addf %21, %24 : vector<1x128xf32>
    %26 = math.rsqrt %25 : vector<1x128xf32>
    %27 = arith.mulf %23, %26 : vector<1x128xf32>
    %28 = vector.broadcast %27 : vector<1x128xf32> to vector<8x128xf32>
    %29 = arith.mulf %16, %28 : vector<8x128xf32>
    %c0_16 = arith.constant 0 : index
    %c0_17 = arith.constant 0 : index
    %c0_18 = arith.constant 0 : index
    %30 = vector.load %arg7[%c0_16, %c0_17, %c0_18] : memref<2x1x128xf32, #tpu.memory_space<vmem>>, vector<1x1x128xf32>
    %31 = vector.shape_cast %30 : vector<1x1x128xf32> to vector<1x128xf32>
    %32 = vector.broadcast %31 : vector<1x128xf32> to vector<8x128xf32>
    %33 = arith.addf %29, %32 : vector<8x128xf32>
    %cst_19 = arith.constant 0.000000e+00 : f32
    %34 = vector.broadcast %cst_19 : f32 to vector<8x128xf32>
    %35 = arith.maximumf %33, %34 : vector<8x128xf32>
    %36 = arith.truncf %35 : vector<8x128xf32> to vector<8x128xbf16>
    %c0_20 = arith.constant 0 : index
    %c0_21 = arith.constant 0 : index
    %37 = vector.load %arg11[%c0_20, %c0_21] : memref<8x128xbf16, #tpu.memory_space<vmem>>, vector<8x128xbf16>
    tpu.vector_store %arg11[%c0_20, %c0_21], %36 {strides = array<i32>} : memref<8x128xbf16, #tpu.memory_space<vmem>>, vector<8x128xbf16>,
    %c0_22 = arith.constant 0 : index
    %c0_23 = arith.constant 0 : index
    %38 = vector.load %arg11[%c0_22, %c0_23] : memref<8x128xbf16, #tpu.memory_space<vmem>>, vector<8x128xbf16>
    %c1 = arith.constant 1 : index
    %c0_24 = arith.constant 0 : index
    %c0_25 = arith.constant 0 : index
    %39 = vector.load %arg4[%c1, %c0_24, %c0_25] : memref<2x128x128xbf16, #tpu.memory_space<vmem>>, vector<1x128x128xbf16>
    %40 = vector.shape_cast %39 : vector<1x128x128xbf16> to vector<128x128xbf16>
    %cst_26 = arith.constant dense<0.000000e+00> : vector<8x128xf32>
    %41 = tpu.matmul %38, %40, %cst_26 {dimension_numbers = #tpu.dot_dimension_numbers<[1], [0], [0], [1], [0, 0, 1, 1], [], []>} : vector<8x128xbf16>, vector<128x128xbf16>, vector<8x128xf32> -> vector<8x128xf32>
    %c1_27 = arith.constant 1 : index
    %c0_28 = arith.constant 0 : index
    %c0_29 = arith.constant 0 : index
    %42 = vector.load %arg5[%c1_27, %c0_28, %c0_29] : memref<2x1x128xf32, #tpu.memory_space<vmem>>, vector<1x1x128xf32>
    %43 = vector.shape_cast %42 : vector<1x1x128xf32> to vector<1x128xf32>
    %44 = vector.broadcast %43 : vector<1x128xf32> to vector<8x128xf32>
    %45 = arith.addf %41, %44 : vector<8x128xf32>
    %cst_30 = arith.constant dense<0.000000e+00> : vector<128xf32>
    %46 = vector.multi_reduction <add>, %45, %cst_30 [0] : vector<8x128xf32> to vector<128xf32>
    %47 = vector.shape_cast %46 : vector<128xf32> to vector<1x128xf32>
    %cst_31 = arith.constant 1.250000e-01 : f32
    %48 = vector.broadcast %cst_31 : f32 to vector<1x128xf32>
    %49 = arith.mulf %47, %48 : vector<1x128xf32>
    %50 = vector.broadcast %49 : vector<1x128xf32> to vector<8x128xf32>
    %51 = arith.subf %45, %50 : vector<8x128xf32>
    %52 = arith.mulf %51, %51 : vector<8x128xf32>
    %cst_32 = arith.constant dense<0.000000e+00> : vector<128xf32>
    %53 = vector.multi_reduction <add>, %52, %cst_32 [0] : vector<8x128xf32> to vector<128xf32>
    %54 = vector.shape_cast %53 : vector<128xf32> to vector<1x128xf32>
    %cst_33 = arith.constant 1.250000e-01 : f32
    %55 = vector.broadcast %cst_33 : f32 to vector<1x128xf32>
    %56 = arith.mulf %54, %55 : vector<1x128xf32>
    %c1_34 = arith.constant 1 : index
    %c0_35 = arith.constant 0 : index
    %c0_36 = arith.constant 0 : index
    %57 = vector.load %arg6[%c1_34, %c0_35, %c0_36] : memref<2x1x128xf32, #tpu.memory_space<vmem>>, vector<1x1x128xf32>
    %58 = vector.shape_cast %57 : vector<1x1x128xf32> to vector<1x128xf32>
    %cst_37 = arith.constant 9.99999974E-6 : f32
    %59 = vector.broadcast %cst_37 : f32 to vector<1x128xf32>
    %60 = arith.addf %56, %59 : vector<1x128xf32>
    %61 = math.rsqrt %60 : vector<1x128xf32>
    %62 = arith.mulf %58, %61 : vector<1x128xf32>
    %63 = vector.broadcast %62 : vector<1x128xf32> to vector<8x128xf32>
    %64 = arith.mulf %51, %63 : vector<8x128xf32>
    %c1_38 = arith.constant 1 : index
    %c0_39 = arith.constant 0 : index
    %c0_40 = arith.constant 0 : index
    %65 = vector.load %arg7[%c1_38, %c0_39, %c0_40] : memref<2x1x128xf32, #tpu.memory_space<vmem>>, vector<1x1x128xf32>
    %66 = vector.shape_cast %65 : vector<1x1x128xf32> to vector<1x128xf32>
    %67 = vector.broadcast %66 : vector<1x128xf32> to vector<8x128xf32>
    %68 = arith.addf %64, %67 : vector<8x128xf32>
    %cst_41 = arith.constant 0.000000e+00 : f32
    %69 = vector.broadcast %cst_41 : f32 to vector<8x128xf32>
    %70 = arith.maximumf %68, %69 : vector<8x128xf32>
    %71 = arith.truncf %70 : vector<8x128xf32> to vector<8x128xbf16>
    %c0_42 = arith.constant 0 : index
    %c0_43 = arith.constant 0 : index
    %72 = vector.load %arg11[%c0_42, %c0_43] : memref<8x128xbf16, #tpu.memory_space<vmem>>, vector<8x128xbf16>
    tpu.vector_store %arg11[%c0_42, %c0_43], %71 {strides = array<i32>} : memref<8x128xbf16, #tpu.memory_space<vmem>>, vector<8x128xbf16>,
    %c1_i32 = arith.constant 1 : i32
    %73 = arith.cmpi eq, %arg0, %c1_i32 : i32
    %74 = arith.extui %73 : i1 to i32
    %c0_i32_44 = arith.constant 0 : i32
    %75 = arith.cmpi ne, %74, %c0_i32_44 : i32
    scf.if %75 {
      %c0_45 = arith.constant 0 : index
      %c0_46 = arith.constant 0 : index
      %76 = vector.load %arg11[%c0_45, %c0_46] : memref<8x128xbf16, #tpu.memory_space<vmem>>, vector<8x128xbf16>
      %c0_47 = arith.constant 0 : index
      %c0_48 = arith.constant 0 : index
      %77 = vector.load %arg8[%c0_47, %c0_48] : memref<128x128xbf16, #tpu.memory_space<vmem>>, vector<128x128xbf16>
      %cst_49 = arith.constant dense<0.000000e+00> : vector<8x128xf32>
      %78 = tpu.matmul %76, %77, %cst_49 {dimension_numbers = #tpu.dot_dimension_numbers<[1], [0], [0], [1], [0, 0, 1, 1], [], []>} : vector<8x128xbf16>, vector<128x128xbf16>, vector<8x128xf32> -> vector<8x128xf32>
      %c0_50 = arith.constant 0 : index
      %c0_51 = arith.constant 0 : index
      %79 = vector.load %arg9[%c0_50, %c0_51] : memref<1x128xf32, #tpu.memory_space<vmem>>, vector<1x128xf32>
      %80 = vector.broadcast %79 : vector<1x128xf32> to vector<8x128xf32>
      %81 = arith.addf %78, %80 : vector<8x128xf32>
      %c0_52 = arith.constant 0 : index
      %c0_53 = arith.constant 0 : index
      %82 = vector.load %arg10[%c0_52, %c0_53] : memref<8x128xf32, #tpu.memory_space<vmem>>, vector<8x128xf32>
      tpu.vector_store %arg10[%c0_52, %c0_53], %81 {strides = array<i32>} : memref<8x128xf32, #tpu.memory_space<vmem>>, vector<8x128xf32>,
    } else {
    }
    return
  }
  func.func @transform_0(%arg0: i32) -> (i32, i32) {
    %c0_i32 = arith.constant 0 : i32
    %c0_i32_0 = arith.constant 0 : i32
    %c0_i32_1 = arith.constant 0 : i32
    return %c0_i32, %c0_i32_0 : i32, i32
  }
  func.func @transform_1(%arg0: i32) -> (i32, i32) {
    %c0_i32 = arith.constant 0 : i32
    %c0_i32_0 = arith.constant 0 : i32
    %c0_i32_1 = arith.constant 0 : i32
    return %c0_i32, %c0_i32_0 : i32, i32
  }
  func.func @transform_2(%arg0: i32) -> (i32, i32) {
    %c0_i32 = arith.constant 0 : i32
    %c0_i32_0 = arith.constant 0 : i32
    %c0_i32_1 = arith.constant 0 : i32
    return %c0_i32, %c0_i32_0 : i32, i32
  }
  func.func @transform_3(%arg0: i32) -> (i32, i32, i32) {
    %c0_i32 = arith.constant 0 : i32
    %c0_i32_0 = arith.constant 0 : i32
    %c0_i32_1 = arith.constant 0 : i32
    return %arg0, %c0_i32, %c0_i32_0 : i32, i32, i32
  }
  func.func @transform_4(%arg0: i32) -> (i32, i32, i32) {
    %c0_i32 = arith.constant 0 : i32
    %c0_i32_0 = arith.constant 0 : i32
    %c0_i32_1 = arith.constant 0 : i32
    return %arg0, %c0_i32, %c0_i32_0 : i32, i32, i32
  }
  func.func @transform_5(%arg0: i32) -> (i32, i32, i32) {
    %c0_i32 = arith.constant 0 : i32
    %c0_i32_0 = arith.constant 0 : i32
    %c0_i32_1 = arith.constant 0 : i32
    return %arg0, %c0_i32, %c0_i32_0 : i32, i32, i32
  }
  func.func @transform_6(%arg0: i32) -> (i32, i32, i32) {
    %c0_i32 = arith.constant 0 : i32
    %c0_i32_0 = arith.constant 0 : i32
    %c0_i32_1 = arith.constant 0 : i32
    return %arg0, %c0_i32, %c0_i32_0 : i32, i32, i32
  }
  func.func @transform_7(%arg0: i32) -> (i32, i32) {
    %c0_i32 = arith.constant 0 : i32
    %c0_i32_0 = arith.constant 0 : i32
    %c0_i32_1 = arith.constant 0 : i32
    return %c0_i32, %c0_i32_0 : i32, i32
  }
  func.func @transform_8(%arg0: i32) -> (i32, i32) {
    %c0_i32 = arith.constant 0 : i32
    %c0_i32_0 = arith.constant 0 : i32
    %c0_i32_1 = arith.constant 0 : i32
    return %c0_i32, %c0_i32_0 : i32, i32
  }
  func.func @transform_9(%arg0: i32) -> (i32, i32) {
    %c0_i32 = arith.constant 0 : i32
    %c0_i32_0 = arith.constant 0 : i32
    %c0_i32_1 = arith.constant 0 : i32
    return %c0_i32, %c0_i32_0 : i32, i32
  }
}

</mosaic_0001>

<bundles_post_ra>
// kernel: _forward.1
= control target key start
LH: loop header
LB: loop body
LE: loop exit
PB: predicated region body
PF: predicated region fallthrough
CT: control target
= control target key end

     0   :  { %14 = vsyncpa [#allocation4], 0  ;;  %s1194_s30 = smov 0   ;;  %s1313_s0 = inlined_call_operand.vmem [shape: bf16[8,128], index: 0, kind: input, shape index: {}]   ;;  %s1314_s1 = inlined_call_operand.vmem [shape: bf16[128,128], index: 1, kind: input, shape index: {}]   ;;  %s1315_s2 = inlined_call_operand.vmem [shape: f32[1,128], index: 2, kind: input, shape index: {}]   ;;  %s1316_s3 = inlined_call_operand.vmem [shape: bf16[4,128,128], index: 3, kind: input, shape index: {}]   ;;  %s1317_s4 = inlined_call_operand.vmem [shape: f32[4,1,128], index: 4, kind: input, shape index: {}]   ;;  %s1318_s5 = inlined_call_operand.vmem [shape: f32[4,1,128], index: 5, kind: input, shape index: {}]   ;;  %s1319_s6 = inlined_call_operand.vmem [shape: f32[4,1,128], index: 6, kind: input, shape index: {}]   ;;  %s1320_s7 = inlined_call_operand.vmem [shape: bf16[128,128], index: 7, kind: input, shape index: {}]   ;;  %s1321_s8 = inlined_call_operand.vmem [shape: f32[1,128], index: 8, kind: input, shape index: {}]   ;;  %s1322_s9 = inlined_call_operand.hbm [shape: f32[8,128], index: 9, kind: output, shape index: {}]  }
   0x1 LB: > { %s1200_s10 = sadd.s32 4294967295, %s1141_s30   ;;  %p885_p0 = scmp.ge.s32.totalorder %s1141_s30, 1  ;;  %s1141_s30 = sphi %s1194_s30, %s20_s30  }
   0x2   : > { %p315_p1 = scmp.lt.s32.totalorder %s1141_s30, 3 }
   0x4   : > { %p316_p2 = pnand %p885_p0, %p315_p1 }
   0x5   : > { %s886_s11 = sshll.u32 (!%p316_p2), %s1200_s10, 1  ;;  %p892_p4 = scmp.ne.s32.totalorder (!%p316_p2), %s1200_s10, 0 }
   0x6   : > { %319 = sbr.rel (%p316_p2) target bundleno = 778 (0x30a), region = 56  ;;  %p360_p3 = scmp.lt.s32.totalorder (!%p316_p2), %s886_s11, 3 }
   0xb   : > { %s1324_s11 = smov (!%p360_p3, %s886_s11), 3  ;;  %384 = sbr.rel (%p892_p4) target bundleno = 182 (0xb6), region = 60 }
   0xc   : > { %s1045_s12 = sshll.u32 %s1324_s11, 6  ;;  %s1208_s15 = scalar_lea.vmem %s1317_s4, %s1324_s11 }
   0xd   : > { %s1213_s18 = scalar_lea.vmem %s1316_s3, %s1045_s12  ;;  %s1218_s21 = scalar_lea.vmem %s1318_s5, %s1324_s11 }
   0xe   : > { %s1223_s24 = scalar_lea.vmem %s1319_s6, %s1324_s11 }
  0x10   : > { %v1053_v0 = vld [vmem:[%s1314_s1 + $0x38] sm:$0xff]  ;;  %v1052_v1 = vld [vmem:[%s1314_s1 + $0x30] sm:$0xff]  ;;  %v1051_v2 = vld [vmem:[%s1314_s1 + $0x28] sm:$0xff] }
  0x11   : > { %454 = vmatpush.bf16.msra.mxu0 %v1053_v0  ;;  %v1050_v3 = vld [vmem:[%s1314_s1 + $0x20] sm:$0xff]  ;;  %v1049_v4 = vld [vmem:[%s1314_s1 + $0x18] sm:$0xff]  ;;  %v1048_v5 = vld [vmem:[%s1314_s1 + $0x10] sm:$0xff] }
  0x12   : > { %v1047_v6 = vld [vmem:[%s1314_s1 + $0x8] sm:$0xff]  ;;  %v1046_v7 = vld [vmem:[%s1314_s1] sm:$0xff] }
  0x13   : > { %v385_v8 = vld [vmem:[%s1313_s0] sm:$0xf] }
  0x14   : > { %v1093_v9 = vld [vmem:[%s1315_s2] ss:$0 sm:$0xff] }
  0x15   : > { %455 = vmatpush.bf16.msra.mxu0 %v1052_v1 }
  0x19   : > { %456 = vmatpush.bf16.msra.mxu0 %v1051_v2 }
  0x1d   : > { %457 = vmatpush.bf16.msra.mxu0 %v1050_v3 }
  0x21   : > { %458 = vmatpush.bf16.msra.mxu0 %v1049_v4 }
  0x25   : > { %459 = vmatpush.bf16.msra.mxu0 %v1048_v5 }
  0x29   : > { %460 = vmatpush.bf16.msra.mxu0 %v1047_v6 }
  0x2d   : > { %461 = vmatpush.bf16.msra.mxu0 %v1046_v7 }
  0x30   : > { %462 = vmatmul.bf16.vlgmr.msra.gmra.mxu0 %v385_v8 }
  0xad   : > { %v463_v10 = vpop.f32.mrf.mxu0 }
  0xae   : > { %v464_v11 = vadd.f32 %v1093_v9, %v463_v10 }
  0xb0   : > { %v467_v12 = vmax.f32 %v464_v11, 0.0 }
  0xb2   : > { %v468_v13 = vpack.c.bf16 %v467_v12, %v467_v12 }
  0xb4   : > { %469 = vst [vmem:[#allocation2] sm:$0xf] %v468_v13 }
  0xb5   : > { %v465_v14 = vpop.f32.mrf.mxu0 }
  0xb6 PF: > { %v1061_v15 = vld [vmem:[%s1213_s18 + $0x38] sm:$0xff]  ;;  %v1060_v16 = vld [vmem:[%s1213_s18 + $0x30] sm:$0xff]  ;;  %v1059_v17 = vld [vmem:[%s1213_s18 + $0x28] sm:$0xff]  ;;  %p1008_p5 = scmp.ne.s32.totalorder %s1200_s10, 1 }
  0xb7   : > { %539 = vmatpush.bf16.msra.mxu0 %v1061_v15  ;;  %v1058_v18 = vld [vmem:[%s1213_s18 + $0x20] sm:$0xff]  ;;  %v1057_v19 = vld [vmem:[%s1213_s18 + $0x18] sm:$0xff]  ;;  %v1056_v20 = vld [vmem:[%s1213_s18 + $0x10] sm:$0xff] }
  0xb8   : > { %v1055_v21 = vld [vmem:[%s1213_s18 + $0x8] sm:$0xff]  ;;  %v1054_v22 = vld [vmem:[%s1213_s18] sm:$0xff]  ;;  %v1069_v32 = vld [vmem:[%s1213_s18 + $0x78] sm:$0xff] }
  0xb9   : > { %v1094_v24 = vld [vmem:[%s1208_s15] ss:$0 sm:$0xff]  ;;  %664 = vmatpush.bf16.msra.mxu1 %v1069_v32  ;;  %v1068_v35 = vld [vmem:[%s1213_s18 + $0x70] sm:$0xff]  ;;  %v1067_v38 = vld [vmem:[%s1213_s18 + $0x68] sm:$0xff] }
  0xba   : > { %v1066_v41 = vld [vmem:[%s1213_s18 + $0x60] sm:$0xff]  ;;  %v1065_v44 = vld [vmem:[%s1213_s18 + $0x58] sm:$0xff]  ;;  %v1064_v47 = vld [vmem:[%s1213_s18 + $0x50] sm:$0xff] }
  0xbb   : > { %540 = vmatpush.bf16.msra.mxu0 %v1060_v16  ;;  %v470_v23 = vld [vmem:[#allocation2] sm:$0xf]  ;;  %v1063_v50 = vld [vmem:[%s1213_s18 + $0x48] sm:$0xff] }
  0xbc   : > { %v1062_v52 = vld [vmem:[%s1213_s18 + $0x40] sm:$0xff] }
  0xbd   : > { %665 = vmatpush.bf16.msra.mxu1 %v1068_v35  ;;  %v568_v58 = vld [vmem:[%s1218_s21] sm:$0x1]  ;;  %v1096_v5 = vld [vmem:[%s1208_s15 + $0x1] ss:$0 sm:$0xff] }
  0xbe   : > { %v1095_v63 = vld [vmem:[%s1223_s24] ss:$0 sm:$0xff] }
  0xbf   : > { %541 = vmatpush.bf16.msra.mxu0 %v1059_v17 }
  0xc1   : > { %666 = vmatpush.bf16.msra.mxu1 %v1067_v38 }
  0xc3   : > { %542 = vmatpush.bf16.msra.mxu0 %v1058_v18 }
  0xc5   : > { %667 = vmatpush.bf16.msra.mxu1 %v1066_v41 }
  0xc7   : > { %543 = vmatpush.bf16.msra.mxu0 %v1057_v19 }
  0xc9   : > { %668 = vmatpush.bf16.msra.mxu1 %v1065_v44 }
  0xcb   : > { %544 = vmatpush.bf16.msra.mxu0 %v1056_v20 }
  0xcd   : > { %669 = vmatpush.bf16.msra.mxu1 %v1064_v47 }
  0xcf   : > { %545 = vmatpush.bf16.msra.mxu0 %v1055_v21 }
  0xd1   : > { %670 = vmatpush.bf16.msra.mxu1 %v1063_v50 }
  0xd3   : > { %546 = vmatpush.bf16.msra.mxu0 %v1054_v22 }
  0xd5   : > { %671 = vmatpush.bf16.msra.mxu1 %v1062_v52 }
  0xd6   : > { %547 = vmatmul.bf16.vlgmr.msra.gmra.mxu0 %v470_v23 }
 0x153   : > { %v548_v25 = vpop.f32.mrf.mxu0 }
 0x154   : > { %v549_v26 = vadd.f32 %v1094_v24, %v548_v25 }
 0x156   : > { %v552_v27 = vrot.slane %v549_v26, 4 }
 0x158   : > { %v553_v28 = vadd.f32 %v552_v27, %v549_v26 }
 0x15a   : > { %v554_v29 = vrot.slane %v553_v28, 2 }
 0x15b   : > { %v550_v30 = vpop.f32.mrf.mxu0 }
 0x15c   : > { %v555_v31 = vadd.f32 %v554_v29, %v553_v28 }
 0x15e   : > { %v556_v33 = vrot.slane %v555_v31, 1 }
 0x160   : > { %v557_v34 = vadd.f32 %v556_v33, %v555_v31  ;;  %v1006_v31 = vld [vmem:[%s1218_s21 + $0x1] sm:$0x1] }
 0x162   : > { %v558_v36 = vmul.f32 0.125, %v557_v34 }
 0x164   : > { %v559_v37 = vsub.f32 %v549_v26, %v558_v36  ;;  %v1097_v36 = vld [vmem:[%s1223_s24 + $0x1] ss:$0 sm:$0xff] }
 0x166   : > { %v560_v39 = vmul.f32 %v559_v37, %v559_v37 }
 0x168   : > { %v561_v40 = vrot.slane %v560_v39, 4 }
 0x16a   : > { %v562_v42 = vadd.f32 %v561_v40, %v560_v39 }
 0x16c   : > { %v563_v43 = vrot.slane %v562_v42, 2 }
 0x16e   : > { %v564_v45 = vadd.f32 %v563_v43, %v562_v42 }
 0x170   : > { %v565_v46 = vrot.slane %v564_v45, 1 }
 0x172   : > { %v566_v48 = vadd.f32 %v565_v46, %v564_v45 }
 0x174   : > { %v567_v49 = vmul.f32 0.125, %v566_v48 }
 0x176   : > { %v569_v51 = vadd.f32 1e-05, %v567_v49 }
 0x178   : > { %1098 = vrsqrt.f32 %v569_v51  ;;  %vm576_vm1 = vweird.f32 %v569_v51 }
 0x17e   : > { %v1099_v53 = vpop.eup %1098 }
 0x17f   : > { %v571_v54 = vmul.f32 %v1099_v53, %v569_v51  ;;  %vm577_vm0 = vweird.f32 %v1099_v53 }
 0x180   : > { %vm578_vm2 = vmor %vm576_vm1, %vm577_vm0 }
 0x181   : > { %v572_v55 = vmul.f32 %v1099_v53, %v571_v54 }
 0x183   : > { %v573_v56 = vmul.f32 0.5, %v572_v55 }
 0x185   : > { %v574_v57 = vsub.f32 1.5, %v573_v56 }
 0x187   : > { %v575_v59 = vmul.f32 %v1099_v53, %v574_v57 }
 0x189   : > { %v579_v60 = vsel %vm578_vm2, %v1099_v53, %v575_v59 }
 0x18a   : > { %v580_v61 = vmul.f32 %v579_v60, %v568_v58 }
 0x18c   : > { %v582_v62 = vperm.slane %v580_v61, 0 }
 0x18e   : > { %v584_v0 = vmul.f32 %v582_v62, %v559_v37 }
 0x190   : > { %v589_v1 = vadd.f32 %v1095_v63, %v584_v0 }
 0x192   : > { %v590_v2 = vmax.f32 %v589_v1, 0.0 }
 0x194   : > { %v591_v3 = vpack.c.bf16 %v590_v2, %v590_v2 }
 0x196   : > { %592 = vst [vmem:[#allocation2] sm:$0xf] %v591_v3 }
 0x19d   : > { %v593_v4 = vld [vmem:[#allocation2] sm:$0xf] }
 0x19e   : > { %672 = vmatmul.bf16.vlgmr.msra.gmra.mxu1 %v593_v4 }
 0x21b   : > { %v673_v6 = vpop.f32.mrf.mxu1 }
 0x21c   : > { %v674_v7 = vadd.f32 %v1096_v5, %v673_v6 }
 0x21e   : > { %v677_v8 = vrot.slane %v674_v7, 4 }
 0x220   : > { %v678_v9 = vadd.f32 %v677_v8, %v674_v7 }
 0x222   : > { %v679_v10 = vrot.slane %v678_v9, 2 }
 0x223   : > { %v675_v11 = vpop.f32.mrf.mxu1 }
 0x224   : > { %v680_v12 = vadd.f32 %v679_v10, %v678_v9 }
 0x226   : > { %v681_v13 = vrot.slane %v680_v12, 1 }
 0x228   : > { %v682_v14 = vadd.f32 %v681_v13, %v680_v12 }
 0x22a   : > { %v683_v15 = vmul.f32 0.125, %v682_v14 }
 0x22c   : > { %v684_v16 = vsub.f32 %v674_v7, %v683_v15 }
 0x22e   : > { %v685_v17 = vmul.f32 %v684_v16, %v684_v16 }
 0x230   : > { %v686_v18 = vrot.slane %v685_v17, 4 }
 0x232   : > { %v687_v19 = vadd.f32 %v686_v18, %v685_v17 }
 0x234   : > { %v688_v20 = vrot.slane %v687_v19, 2 }
 0x236   : > { %v689_v21 = vadd.f32 %v688_v20, %v687_v19 }
 0x238   : > { %v690_v22 = vrot.slane %v689_v21, 1 }
 0x23a   : > { %v691_v23 = vadd.f32 %v690_v22, %v689_v21 }
 0x23c   : > { %v692_v24 = vmul.f32 0.125, %v691_v23 }
 0x23e   : > { %v695_v25 = vadd.f32 1e-05, %v692_v24 }
 0x240   : > { %1100 = vrsqrt.f32 %v695_v25  ;;  %vm702_vm4 = vweird.f32 %v695_v25 }
 0x246   : > { %v1101_v26 = vpop.eup %1100 }
 0x247   : > { %v697_v27 = vmul.f32 %v1101_v26, %v695_v25  ;;  %vm703_vm3 = vweird.f32 %v1101_v26 }
 0x248   : > { %vm704_vm5 = vmor %vm702_vm4, %vm703_vm3 }
 0x249   : > { %v698_v28 = vmul.f32 %v1101_v26, %v697_v27 }
 0x24b   : > { %v699_v29 = vmul.f32 0.5, %v698_v28 }
 0x24d   : > { %v700_v30 = vsub.f32 1.5, %v699_v29 }
 0x24f   : > { %v701_v32 = vmul.f32 %v1101_v26, %v700_v30 }
 0x251   : > { %v705_v33 = vsel %vm704_vm5, %v1101_v26, %v701_v32 }
 0x252   : > { %v706_v34 = vmul.f32 %v1006_v31, %v705_v33 }
 0x254   : > { %v708_v35 = vperm.slane %v706_v34, 0 }
 0x256   : > { %v710_v37 = vmul.f32 %v708_v35, %v684_v16 }
 0x258   : > { %v716_v38 = vadd.f32 %v1097_v36, %v710_v37 }
 0x25a   : > { %v717_v39 = vmax.f32 %v716_v38, 0.0  ;;  %723 = sbr.rel (%p1008_p5) target bundleno = 773 (0x305), region = 64 }
 0x25c   : > { %v718_v40 = vpack.c.bf16 %v717_v39, %v717_v39 }
 0x25e   : > { %719 = vst [vmem:[#allocation2] sm:$0xf] %v718_v40 }
 0x25f   : > { %v1077_v41 = vld [vmem:[%s1320_s7 + $0x38] sm:$0xff]  ;;  %v1076_v42 = vld [vmem:[%s1320_s7 + $0x30] sm:$0xff]  ;;  %v1075_v43 = vld [vmem:[%s1320_s7 + $0x28] sm:$0xff] }
 0x260   : > { %793 = vmatpush.bf16.msra.mxu0 %v1077_v41  ;;  %v1074_v44 = vld [vmem:[%s1320_s7 + $0x20] sm:$0xff]  ;;  %v1073_v45 = vld [vmem:[%s1320_s7 + $0x18] sm:$0xff]  ;;  %v1072_v46 = vld [vmem:[%s1320_s7 + $0x10] sm:$0xff] }
 0x261   : > { %v1071_v47 = vld [vmem:[%s1320_s7 + $0x8] sm:$0xff]  ;;  %v1070_v48 = vld [vmem:[%s1320_s7] sm:$0xff] }
 0x262   : > { %v1102_v50 = vld [vmem:[%s1321_s8] ss:$0 sm:$0xff] }
 0x264   : > { %794 = vmatpush.bf16.msra.mxu0 %v1076_v42 }
 0x265   : > { %v724_v49 = vld [vmem:[#allocation2] sm:$0xf] }
 0x268   : > { %795 = vmatpush.bf16.msra.mxu0 %v1075_v43 }
 0x26c   : > { %796 = vmatpush.bf16.msra.mxu0 %v1074_v44 }
 0x270   : > { %797 = vmatpush.bf16.msra.mxu0 %v1073_v45 }
 0x274   : > { %798 = vmatpush.bf16.msra.mxu0 %v1072_v46 }
 0x278   : > { %799 = vmatpush.bf16.msra.mxu0 %v1071_v47 }
 0x27c   : > { %800 = vmatpush.bf16.msra.mxu0 %v1070_v48 }
 0x27f   : > { %801 = vmatmul.bf16.vlgmr.msra.gmra.mxu0 %v724_v49 }
 0x2fc   : > { %v802_v51 = vpop.f32.mrf.mxu0 }
 0x2fd   : > { %v803_v52 = vadd.f32 %v1102_v50, %v802_v51 }
 0x2ff   : > { %806 = vst [vmem:[#allocation3] sm:$0xff] %v803_v52 }
 0x304   : > { %v804_v53 = vpop.f32.mrf.mxu0 }
 0x305 PF: > { %p1082_p6 = scmp.eq.s32.totalorder %s1200_s10, 1  ;;  %s1143_s29 = smov [#allocation3]  }
 0x306   : > { %s813_s15 = sshll.u32 %s1143_s29, 4  ;;  %s815_s12 = sshll.u32 %s1322_s9, 4  ;;  %s814_s15 = int_to_ptr.vmem [resolvable:$true] %s813_s15  ;;  %s816_s12 = int_to_ptr.hbm [resolvable:$true] %s815_s12 }
 0x307   : > { %1079 = dma.vmem_to_hbm [thread:$0]  (%p1082_p6), %s814_s15, 128, %s816_s12, [#allocation4]  }
 0x308   : > { %1136 = dma.done.wait (%p1082_p6), [#allocation4], 128  }
 0x309   : > { %1138 = vsyncadd (%p1082_p6), [#allocation4], 4294967168 }
 0x30a PF: > { %s20_s30 = sadd.s32 1, %s1141_s30  }
 0x30b   : > { %p17_p7 = scmp.ge.s32.totalorder %s20_s30, 4  }
 0x30d   :  { %19 = sbr.rel (!%p17_p7) target bundleno = 1 (0x1), region = 104 }
 0x312   :  { %829 = vsyncpa [#allocation4], 1 }
 0x313   :  { %831 = vsyncpa [#allocation4 + $0x1], 1 }

// kernel: _forward.1
= control target key start
LH: loop header
LB: loop body
LE: loop exit
PB: predicated region body
PF: predicated region fallthrough
CT: control target
= control target key end

     0   :  { %14 = vsyncpa [#allocation4], 0  ;;  %s1194_s30 = smov 0   ;;  %s1313_s0 = inlined_call_operand.vmem [shape: bf16[8,128], index: 0, kind: input, shape index: {}]   ;;  %s1314_s1 = inlined_call_operand.vmem [shape: bf16[128,128], index: 1, kind: input, shape index: {}]   ;;  %s1315_s2 = inlined_call_operand.vmem [shape: f32[1,128], index: 2, kind: input, shape index: {}]   ;;  %s1316_s3 = inlined_call_operand.vmem [shape: bf16[4,128,128], index: 3, kind: input, shape index: {}]   ;;  %s1317_s4 = inlined_call_operand.vmem [shape: f32[4,1,128], index: 4, kind: input, shape index: {}]   ;;  %s1318_s5 = inlined_call_operand.vmem [shape: f32[4,1,128], index: 5, kind: input, shape index: {}]   ;;  %s1319_s6 = inlined_call_operand.vmem [shape: f32[4,1,128], index: 6, kind: input, shape index: {}]   ;;  %s1320_s7 = inlined_call_operand.vmem [shape: bf16[128,128], index: 7, kind: input, shape index: {}]   ;;  %s1321_s8 = inlined_call_operand.vmem [shape: f32[1,128], index: 8, kind: input, shape index: {}]   ;;  %s1322_s9 = inlined_call_operand.hbm [shape: f32[8,128], index: 9, kind: output, shape index: {}]  }
   0x1 LB: > { %s1200_s10 = sadd.s32 4294967295, %s1141_s30   ;;  %p885_p0 = scmp.ge.s32.totalorder %s1141_s30, 1  ;;  %s1141_s30 = sphi %s1194_s30, %s20_s30  }
   0x2   : > { %p315_p1 = scmp.lt.s32.totalorder %s1141_s30, 3 }
   0x4   : > { %p316_p2 = pnand %p885_p0, %p315_p1 }
   0x5   : > { %s886_s11 = sshll.u32 (!%p316_p2), %s1200_s10, 1  ;;  %p892_p4 = scmp.ne.s32.totalorder (!%p316_p2), %s1200_s10, 0 }
   0x6   : > { %319 = sbr.rel (%p316_p2) target bundleno = 778 (0x30a), region = 56  ;;  %p360_p3 = scmp.lt.s32.totalorder (!%p316_p2), %s886_s11, 3 }
   0xb   : > { %s1324_s11 = smov (!%p360_p3, %s886_s11), 3  ;;  %384 = sbr.rel (%p892_p4) target bundleno = 182 (0xb6), region = 60 }
   0xc   : > { %s1045_s12 = sshll.u32 %s1324_s11, 6  ;;  %s1208_s15 = scalar_lea.vmem %s1317_s4, %s1324_s11 }
   0xd   : > { %s1213_s18 = scalar_lea.vmem %s1316_s3, %s1045_s12  ;;  %s1218_s21 = scalar_lea.vmem %s1318_s5, %s1324_s11 }
   0xe   : > { %s1223_s24 = scalar_lea.vmem %s1319_s6, %s1324_s11 }
  0x10   : > { %v1053_v0 = vld [vmem:[%s1314_s1 + $0x38] sm:$0xff]  ;;  %v1052_v1 = vld [vmem:[%s1314_s1 + $0x30] sm:$0xff]  ;;  %v1051_v2 = vld [vmem:[%s1314_s1 + $0x28] sm:$0xff] }
  0x11   : > { %454 = vmatpush.bf16.msra.mxu0 %v1053_v0  ;;  %v1050_v3 = vld [vmem:[%s1314_s1 + $0x20] sm:$0xff]  ;;  %v1049_v4 = vld [vmem:[%s1314_s1 + $0x18] sm:$0xff]  ;;  %v1048_v5 = vld [vmem:[%s1314_s1 + $0x10] sm:$0xff] }
  0x12   : > { %v1047_v6 = vld [vmem:[%s1314_s1 + $0x8] sm:$0xff]  ;;  %v1046_v7 = vld [vmem:[%s1314_s1] sm:$0xff] }
  0x13   : > { %v385_v8 = vld [vmem:[%s1313_s0] sm:$0xf] }
  0x14   : > { %v1093_v9 = vld [vmem:[%s1315_s2] ss:$0 sm:$0xff] }
  0x15   : > { %455 = vmatpush.bf16.msra.mxu0 %v1052_v1 }
  0x19   : > { %456 = vmatpush.bf16.msra.mxu0 %v1051_v2 }
  0x1d   : > { %457 = vmatpush.bf16.msra.mxu0 %v1050_v3 }
  0x21   : > { %458 = vmatpush.bf16.msra.mxu0 %v1049_v4 }
  0x25   : > { %459 = vmatpush.bf16.msra.mxu0 %v1048_v5 }
  0x29   : > { %460 = vmatpush.bf16.msra.mxu0 %v1047_v6 }
  0x2d   : > { %461 = vmatpush.bf16.msra.mxu0 %v1046_v7 }
  0x30   : > { %462 = vmatmul.bf16.vlgmr.msra.gmra.mxu0 %v385_v8 }
  0xad   : > { %v463_v10 = vpop.f32.mrf.mxu0 }
  0xae   : > { %v464_v11 = vadd.f32 %v1093_v9, %v463_v10 }
  0xb0   : > { %v467_v12 = vmax.f32 %v464_v11, 0.0 }
  0xb2   : > { %v468_v13 = vpack.c.bf16 %v467_v12, %v467_v12 }
  0xb4   : > { %469 = vst [vmem:[#allocation2] sm:$0xf] %v468_v13 }
  0xb5   : > { %v465_v14 = vpop.f32.mrf.mxu0 }
  0xb6 PF: > { %v1061_v15 = vld [vmem:[%s1213_s18 + $0x38] sm:$0xff]  ;;  %v1060_v16 = vld [vmem:[%s1213_s18 + $0x30] sm:$0xff]  ;;  %v1059_v17 = vld [vmem:[%s1213_s18 + $0x28] sm:$0xff]  ;;  %p1008_p5 = scmp.ne.s32.totalorder %s1200_s10, 1 }
  0xb7   : > { %539 = vmatpush.bf16.msra.mxu0 %v1061_v15  ;;  %v1058_v18 = vld [vmem:[%s1213_s18 + $0x20] sm:$0xff]  ;;  %v1057_v19 = vld [vmem:[%s1213_s18 + $0x18] sm:$0xff]  ;;  %v1056_v20 = vld [vmem:[%s1213_s18 + $0x10] sm:$0xff] }
  0xb8   : > { %v1055_v21 = vld [vmem:[%s1213_s18 + $0x8] sm:$0xff]  ;;  %v1054_v22 = vld [vmem:[%s1213_s18] sm:$0xff]  ;;  %v1069_v32 = vld [vmem:[%s1213_s18 + $0x78] sm:$0xff] }
  0xb9   : > { %v1094_v24 = vld [vmem:[%s1208_s15] ss:$0 sm:$0xff]  ;;  %664 = vmatpush.bf16.msra.mxu1 %v1069_v32  ;;  %v1068_v35 = vld [vmem:[%s1213_s18 + $0x70] sm:$0xff]  ;;  %v1067_v38 = vld [vmem:[%s1213_s18 + $0x68] sm:$0xff] }
  0xba   : > { %v1066_v41 = vld [vmem:[%s1213_s18 + $0x60] sm:$0xff]  ;;  %v1065_v44 = vld [vmem:[%s1213_s18 + $0x58] sm:$0xff]  ;;  %v1064_v47 = vld [vmem:[%s1213_s18 + $0x50] sm:$0xff] }
  0xbb   : > { %540 = vmatpush.bf16.msra.mxu0 %v1060_v16  ;;  %v470_v23 = vld [vmem:[#allocation2] sm:$0xf]  ;;  %v1063_v50 = vld [vmem:[%s1213_s18 + $0x48] sm:$0xff] }
  0xbc   : > { %v1062_v52 = vld [vmem:[%s1213_s18 + $0x40] sm:$0xff] }
  0xbd   : > { %665 = vmatpush.bf16.msra.mxu1 %v1068_v35  ;;  %v568_v58 = vld [vmem:[%s1218_s21] sm:$0x1]  ;;  %v1096_v5 = vld [vmem:[%s1208_s15 + $0x1] ss:$0 sm:$0xff] }
  0xbe   : > { %v1095_v63 = vld [vmem:[%s1223_s24] ss:$0 sm:$0xff] }
  0xbf   : > { %541 = vmatpush.bf16.msra.mxu0 %v1059_v17 }
  0xc1   : > { %666 = vmatpush.bf16.msra.mxu1 %v1067_v38 }
  0xc3   : > { %542 = vmatpush.bf16.msra.mxu0 %v1058_v18 }
  0xc5   : > { %667 = vmatpush.bf16.msra.mxu1 %v1066_v41 }
  0xc7   : > { %543 = vmatpush.bf16.msra.mxu0 %v1057_v19 }
  0xc9   : > { %668 = vmatpush.bf16.msra.mxu1 %v1065_v44 }
  0xcb   : > { %544 = vmatpush.bf16.msra.mxu0 %v1056_v20 }
  0xcd   : > { %669 = vmatpush.bf16.msra.mxu1 %v1064_v47 }
  0xcf   : > { %545 = vmatpush.bf16.msra.mxu0 %v1055_v21 }
  0xd1   : > { %670 = vmatpush.bf16.msra.mxu1 %v1063_v50 }
  0xd3   : > { %546 = vmatpush.bf16.msra.mxu0 %v1054_v22 }
  0xd5   : > { %671 = vmatpush.bf16.msra.mxu1 %v1062_v52 }
  0xd6   : > { %547 = vmatmul.bf16.vlgmr.msra.gmra.mxu0 %v470_v23 }
 0x153   : > { %v548_v25 = vpop.f32.mrf.mxu0 }
 0x154   : > { %v549_v26 = vadd.f32 %v1094_v24, %v548_v25 }
 0x156   : > { %v552_v27 = vrot.slane %v549_v26, 4 }
 0x158   : > { %v553_v28 = vadd.f32 %v552_v27, %v549_v26 }
 0x15a   : > { %v554_v29 = vrot.slane %v553_v28, 2 }
 0x15b   : > { %v550_v30 = vpop.f32.mrf.mxu0 }
 0x15c   : > { %v555_v31 = vadd.f32 %v554_v29, %v553_v28 }
 0x15e   : > { %v556_v33 = vrot.slane %v555_v31, 1 }
 0x160   : > { %v557_v34 = vadd.f32 %v556_v33, %v555_v31  ;;  %v1006_v31 = vld [vmem:[%s1218_s21 + $0x1] sm:$0x1] }
 0x162   : > { %v558_v36 = vmul.f32 0.125, %v557_v34 }
 0x164   : > { %v559_v37 = vsub.f32 %v549_v26, %v558_v36  ;;  %v1097_v36 = vld [vmem:[%s1223_s24 + $0x1] ss:$0 sm:$0xff] }
 0x166   : > { %v560_v39 = vmul.f32 %v559_v37, %v559_v37 }
 0x168   : > { %v561_v40 = vrot.slane %v560_v39, 4 }
 0x16a   : > { %v562_v42 = vadd.f32 %v561_v40, %v560_v39 }
 0x16c   : > { %v563_v43 = vrot.slane %v562_v42, 2 }
 0x16e   : > { %v564_v45 = vadd.f32 %v563_v43, %v562_v42 }
 0x170   : > { %v565_v46 = vrot.slane %v564_v45, 1 }
 0x172   : > { %v566_v48 = vadd.f32 %v565_v46, %v564_v45 }
 0x174   : > { %v567_v49 = vmul.f32 0.125, %v566_v48 }
 0x176   : > { %v569_v51 = vadd.f32 1e-05, %v567_v49 }
 0x178   : > { %1098 = vrsqrt.f32 %v569_v51  ;;  %vm576_vm1 = vweird.f32 %v569_v51 }
 0x17e   : > { %v1099_v53 = vpop.eup %1098 }
 0x17f   : > { %v571_v54 = vmul.f32 %v1099_v53, %v569_v51  ;;  %vm577_vm0 = vweird.f32 %v1099_v53 }
 0x180   : > { %vm578_vm2 = vmor %vm576_vm1, %vm577_vm0 }
 0x181   : > { %v572_v55 = vmul.f32 %v1099_v53, %v571_v54 }
 0x183   : > { %v573_v56 = vmul.f32 0.5, %v572_v55 }
 0x185   : > { %v574_v57 = vsub.f32 1.5, %v573_v56 }
 0x187   : > { %v575_v59 = vmul.f32 %v1099_v53, %v574_v57 }
 0x189   : > { %v579_v60 = vsel %vm578_vm2, %v1099_v53, %v575_v59 }
 0x18a   : > { %v580_v61 = vmul.f32 %v579_v60, %v568_v58 }
 0x18c   : > { %v582_v62 = vperm.slane %v580_v61, 0 }
 0x18e   : > { %v584_v0 = vmul.f32 %v582_v62, %v559_v37 }
 0x190   : > { %v589_v1 = vadd.f32 %v1095_v63, %v584_v0 }
 0x192   : > { %v590_v2 = vmax.f32 %v589_v1, 0.0 }
 0x194   : > { %v591_v3 = vpack.c.bf16 %v590_v2, %v590_v2 }
 0x196   : > { %592 = vst [vmem:[#allocation2] sm:$0xf] %v591_v3 }
 0x19d   : > { %v593_v4 = vld [vmem:[#allocation2] sm:$0xf] }
 0x19e   : > { %672 = vmatmul.bf16.vlgmr.msra.gmra.mxu1 %v593_v4 }
 0x21b   : > { %v673_v6 = vpop.f32.mrf.mxu1 }
 0x21c   : > { %v674_v7 = vadd.f32 %v1096_v5, %v673_v6 }
 0x21e   : > { %v677_v8 = vrot.slane %v674_v7, 4 }
 0x220   : > { %v678_v9 = vadd.f32 %v677_v8, %v674_v7 }
 0x222   : > { %v679_v10 = vrot.slane %v678_v9, 2 }
 0x223   : > { %v675_v11 = vpop.f32.mrf.mxu1 }
 0x224   : > { %v680_v12 = vadd.f32 %v679_v10, %v678_v9 }
 0x226   : > { %v681_v13 = vrot.slane %v680_v12, 1 }
 0x228   : > { %v682_v14 = vadd.f32 %v681_v13, %v680_v12 }
 0x22a   : > { %v683_v15 = vmul.f32 0.125, %v682_v14 }
 0x22c   : > { %v684_v16 = vsub.f32 %v674_v7, %v683_v15 }
 0x22e   : > { %v685_v17 = vmul.f32 %v684_v16, %v684_v16 }
 0x230   : > { %v686_v18 = vrot.slane %v685_v17, 4 }
 0x232   : > { %v687_v19 = vadd.f32 %v686_v18, %v685_v17 }
 0x234   : > { %v688_v20 = vrot.slane %v687_v19, 2 }
 0x236   : > { %v689_v21 = vadd.f32 %v688_v20, %v687_v19 }
 0x238   : > { %v690_v22 = vrot.slane %v689_v21, 1 }
 0x23a   : > { %v691_v23 = vadd.f32 %v690_v22, %v689_v21 }
 0x23c   : > { %v692_v24 = vmul.f32 0.125, %v691_v23 }
 0x23e   : > { %v695_v25 = vadd.f32 1e-05, %v692_v24 }
 0x240   : > { %1100 = vrsqrt.f32 %v695_v25  ;;  %vm702_vm4 = vweird.f32 %v695_v25 }
 0x246   : > { %v1101_v26 = vpop.eup %1100 }
 0x247   : > { %v697_v27 = vmul.f32 %v1101_v26, %v695_v25  ;;  %vm703_vm3 = vweird.f32 %v1101_v26 }
 0x248   : > { %vm704_vm5 = vmor %vm702_vm4, %vm703_vm3 }
 0x249   : > { %v698_v28 = vmul.f32 %v1101_v26, %v697_v27 }
 0x24b   : > { %v699_v29 = vmul.f32 0.5, %v698_v28 }
 0x24d   : > { %v700_v30 = vsub.f32 1.5, %v699_v29 }
 0x24f   : > { %v701_v32 = vmul.f32 %v1101_v26, %v700_v30 }
 0x251   : > { %v705_v33 = vsel %vm704_vm5, %v1101_v26, %v701_v32 }
 0x252   : > { %v706_v34 = vmul.f32 %v1006_v31, %v705_v33 }
 0x254   : > { %v708_v35 = vperm.slane %v706_v34, 0 }
 0x256   : > { %v710_v37 = vmul.f32 %v708_v35, %v684_v16 }
 0x258   : > { %v716_v38 = vadd.f32 %v1097_v36, %v710_v37 }
 0x25a   : > { %v717_v39 = vmax.f32 %v716_v38, 0.0  ;;  %723 = sbr.rel (%p1008_p5) target bundleno = 773 (0x305), region = 64 }
 0x25c   : > { %v718_v40 = vpack.c.bf16 %v717_v39, %v717_v39 }
 0x25e   : > { %719 = vst [vmem:[#allocation2] sm:$0xf] %v718_v40 }
 0x25f   : > { %v1077_v41 = vld [vmem:[%s1320_s7 + $0x38] sm:$0xff]  ;;  %v1076_v42 = vld [vmem:[%s1320_s7 + $0x30] sm:$0xff]  ;;  %v1075_v43 = vld [vmem:[%s1320_s7 + $0x28] sm:$0xff] }
 0x260   : > { %793 = vmatpush.bf16.msra.mxu0 %v1077_v41  ;;  %v1074_v44 = vld [vmem:[%s1320_s7 + $0x20] sm:$0xff]  ;;  %v1073_v45 = vld [vmem:[%s1320_s7 + $0x18] sm:$0xff]  ;;  %v1072_v46 = vld [vmem:[%s1320_s7 + $0x10] sm:$0xff] }
 0x261   : > { %v1071_v47 = vld [vmem:[%s1320_s7 + $0x8] sm:$0xff]  ;;  %v1070_v48 = vld [vmem:[%s1320_s7] sm:$0xff] }
 0x262   : > { %v1102_v50 = vld [vmem:[%s1321_s8] ss:$0 sm:$0xff] }
 0x264   : > { %794 = vmatpush.bf16.msra.mxu0 %v1076_v42 }
 0x265   : > { %v724_v49 = vld [vmem:[#allocation2] sm:$0xf] }
 0x268   : > { %795 = vmatpush.bf16.msra.mxu0 %v1075_v43 }
 0x26c   : > { %796 = vmatpush.bf16.msra.mxu0 %v1074_v44 }
 0x270   : > { %797 = vmatpush.bf16.msra.mxu0 %v1073_v45 }
 0x274   : > { %798 = vmatpush.bf16.msra.mxu0 %v1072_v46 }
 0x278   : > { %799 = vmatpush.bf16.msra.mxu0 %v1071_v47 }
 0x27c   : > { %800 = vmatpush.bf16.msra.mxu0 %v1070_v48 }
 0x27f   : > { %801 = vmatmul.bf16.vlgmr.msra.gmra.mxu0 %v724_v49 }
 0x2fc   : > { %v802_v51 = vpop.f32.mrf.mxu0 }
 0x2fd   : > { %v803_v52 = vadd.f32 %v1102_v50, %v802_v51 }
 0x2ff   : > { %806 = vst [vmem:[#allocation3] sm:$0xff] %v803_v52 }
 0x304   : > { %v804_v53 = vpop.f32.mrf.mxu0 }
 0x305 PF: > { %p1082_p6 = scmp.eq.s32.totalorder %s1200_s10, 1  ;;  %s1143_s29 = smov [#allocation3]  }
 0x306   : > { %s813_s15 = sshll.u32 %s1143_s29, 4  ;;  %s815_s12 = sshll.u32 %s1322_s9, 4  ;;  %s814_s15 = int_to_ptr.vmem [resolvable:$true] %s813_s15  ;;  %s816_s12 = int_to_ptr.hbm [resolvable:$true] %s815_s12 }
 0x307   : > { %1079 = dma.vmem_to_hbm [thread:$0]  (%p1082_p6), %s814_s15, 128, %s816_s12, [#allocation4]  }
 0x308   : > { %1136 = dma.done.wait (%p1082_p6), [#allocation4], 128  }
 0x309   : > { %1138 = vsyncadd (%p1082_p6), [#allocation4], 4294967168 }
 0x30a PF: > { %s20_s30 = sadd.s32 1, %s1141_s30  }
 0x30b   : > { %p17_p7 = scmp.ge.s32.totalorder %s20_s30, 4  }
 0x30d   :  { %19 = sbr.rel (!%p17_p7) target bundleno = 1 (0x1), region = 104 }
 0x312   :  { %829 = vsyncpa [#allocation4], 1 }
 0x313   :  { %831 = vsyncpa [#allocation4 + $0x1], 1 }

</bundles_post_ra>
